<compile_context>
chip_gen: v7x
topology: tpu7x:2x2x1
jax: 0.10.0
libtpu: 0.0.40
codegen_flags: <defaults>
</compile_context>

<pallas_src>
import functools
import math

import jax
import jax.numpy as jnp
from jax.experimental import pallas as pl
from jax.experimental.pallas import tpu as pltpu


def _drop_path_kernel(scale_ref, x_ref, o_ref):
    """scale_ref: (TB, 1) f32 in VMEM (0 or 1/keep_prob); x_ref/o_ref: (TB, TF)."""
    o_ref[...] = (x_ref[...].astype(jnp.float32) * scale_ref[...]).astype(o_ref.dtype)


# Budget for the whole double-buffered working set (x-in + out + scale, 2x each).
_VMEM_BUDGET = 16 * 1024 * 1024


def _round_up(x, m):
    return ((x + m - 1) // m) * m


def _tile_vmem_bytes(tb, tf, itemsize, pack):
    """Real (padded) VMEM footprint of one grid step's buffers, double-buffered."""
    data = _round_up(tb, pack) * tf * itemsize       # one x (or out) tile
    scale = _round_up(tb, 8) * 128 * 4               # (tb, 1) f32, lane-padded
    return 2 * (2 * data + scale)


def _choose_tiles(rows, cols, itemsize):
    """Pick (tb, tf). `cols` is a multiple of 128.

    Guarantees: tf % 128 == 0 and tf | cols;  tb % pack == 0 or tb == rows;
    double-buffered footprint (with sublane/lane padding) <= _VMEM_BUDGET.
    """
    pack = max(8, 32 // max(1, itemsize))            # f32: 8, bf16: 16, int8: 32
    # Widest tf (multiple of 128 dividing cols) such that a pack-row tile fits.
    tf_cap = max(128, (_VMEM_BUDGET - 2 * pack * 512) // (4 * pack * itemsize))
    tf = 128                                         # cols % 128 == 0 -> always legal
    t = 256
    while t <= min(cols, tf_cap):
        if cols % t == 0:
            tf = t
        t += 128
    # Tallest tb: whole rows if the padded footprint fits, else largest pack-multiple.
    if _tile_vmem_bytes(rows, tf, itemsize, pack) <= _VMEM_BUDGET:
        tb = rows
    else:
        max_tb = _VMEM_BUDGET // (4 * tf * itemsize + 1024)
        tb = max(pack, (max_tb // pack) * pack)
    return tb, tf


@functools.partial(jax.jit, static_argnames=("p", "training"))
def drop_path(x, p, training, key):
    """Functional equivalent of DropPath_.forward (PyTorch mutates x in place;
    JAX is functional, so a new array is returned)."""
    if (not training) or p == 0.0:
        return x
    if p >= 1.0:
        # TODO(synk): PyTorch's in-place op yields NaN here (x / 0 * 0); we return
        # the well-defined all-paths-dropped limit instead.
        return jnp.zeros_like(x)

    keep_prob = 1.0 - p
    n = x.shape[0]

    # Fold leading feature dims into the row axis while the batch is smaller than
    # a sublane group, as long as the remaining feature dim stays lane-dense.
    lead_dims = list(x.shape[1:])
    fold = 1
    while n * fold < 8 and len(lead_dims) > 1 and math.prod(lead_dims[1:]) >= 128:
        fold *= lead_dims.pop(0)
    rows = n * fold
    cols = math.prod(lead_dims) if lead_dims else 1

    x2 = x.reshape(rows, cols)

    # Pad the feature dim to a multiple of 128 only when needed: lane-dense
    # (unmasked) stores and bounded block shapes for awkward CHW.
    cols_p = max(128, _round_up(cols, 128))
    if cols_p != cols:
        x2 = jnp.pad(x2, ((0, 0), (0, cols_p - cols)))

    # Per-sample keep mask, pre-scaled in f32 (precision-safe for bf16 inputs).
    mask = jax.random.bernoulli(key, keep_prob, (n, 1))
    scale = mask.astype(jnp.float32) * (1.0 / keep_prob)    # (N, 1): 0 or 1/keep_prob
    if fold > 1:
        scale = jnp.repeat(scale, fold, axis=0)             # (rows, 1)

    itemsize = jnp.dtype(x.dtype).itemsize
    tb, tf = _choose_tiles(rows, cols_p, itemsize)
    grid = (pl.cdiv(rows, tb), cols_p // tf)

    out2 = pl.pallas_call(
        _drop_path_kernel,
        out_shape=jax.ShapeDtypeStruct((rows, cols_p), x.dtype),
        grid=grid,
        in_specs=[
            pl.BlockSpec((tb, 1), lambda i, j: (i, 0)),     # f32 scale, VMEM
            pl.BlockSpec((tb, tf), lambda i, j: (i, j)),    # lane-dense x tile
        ],
        out_specs=pl.BlockSpec((tb, tf), lambda i, j: (i, j)),
        compiler_params=pltpu.CompilerParams(
            dimension_semantics=("parallel", "parallel"),
            vmem_limit_bytes=32 * 1024 * 1024,
        ),
        cost_estimate=pl.CostEstimate(
            flops=rows * cols_p,
            transcendentals=0,
            bytes_accessed=2 * rows * cols_p * itemsize + 4 * rows,
        ),
    )(scale, x2)

    if cols_p != cols:
        out2 = out2[:, :cols]
    return out2.reshape(x.shape)


class DropPathPallas:
    """Mirror of the PyTorch DropPath_ module (p = prob of a path being zeroed)."""

    def __init__(self, p=0.0):
        self.p = float(p)
        self.training = True

    def __call__(self, x, key):
        return drop_path(x, self.p, self.training, key)


if __name__ == "__main__":
    key = jax.random.PRNGKey(0)
    k_x, k_mask, k_x2 = jax.random.split(key, 3)

    # small NCHW input consistent with the module's conv-style usage
    x = jax.random.normal(k_x, (2, 4, 16, 16), dtype=jnp.float32)

    module = DropPathPallas(p=0.5)
    module.training = True

    out = jax.block_until_ready(module(x, k_mask))

    # reference check (pure JAX) with the same mask draw
    keep_prob = 1.0 - module.p
    mask_ref = jax.random.bernoulli(
        k_mask, keep_prob, (x.shape[0], 1)
    ).astype(jnp.float32)
    expected = x * (mask_ref[:, :, None, None] / keep_prob)
    assert out.shape == x.shape and out.dtype == x.dtype
    assert jnp.allclose(out, expected, atol=1e-6, rtol=1e-6)

    # non-128-divisible feature dim exercises the padded / non-folded path
    x_odd = jax.random.normal(k_x2, (2, 3, 7, 9), dtype=jnp.float32)
    out_odd = jax.block_until_ready(module(x_odd, k_mask))
    mask_odd = jax.random.bernoulli(
        k_mask, keep_prob, (x_odd.shape[0], 1)
    ).astype(jnp.float32)
    expected_odd = x_odd * (mask_odd[:, :, None, None] / keep_prob)
    assert out_odd.shape == x_odd.shape
    assert jnp.allclose(out_odd, expected_odd, atol=1e-6, rtol=1e-6)

    # eval mode → identity
    module.training = False
    out_eval = jax.block_until_ready(module(x, k_mask))
    assert jnp.allclose(out_eval, x)

    # p = 0 in training → identity
    module_p0 = DropPathPallas(p=0.0)
    out_p0 = jax.block_until_ready(module_p0(x, k_mask))
    assert jnp.allclose(out_p0, x)

    print("KERNEL_OK")
</pallas_src>

<mosaic_0001>
module attributes {stable_mosaic.version = 11 : i64} {
  func.func @_drop_path_kernel(%arg0: i32, %arg1: i32, %arg2: memref<8x1xf32, #tpu.memory_space<vmem>>, %arg3: memref<8x256xf32, #tpu.memory_space<vmem>>, %arg4: memref<8x256xf32, #tpu.memory_space<vmem>>) attributes {dimension_semantics = [#tpu.dimension_semantics<parallel>, #tpu.dimension_semantics<parallel>], iteration_bounds = array<i64: 1, 1>, scalar_prefetch = 0 : i64, scratch_operands = 0 : i64, tpu.core_type = #tpu.core_type<tc>, window_params = [{transform_indices = @transform_0, window_bounds = array<i64: 8, 1>}, {transform_indices = @transform_1, window_bounds = array<i64: 8, 256>}, {transform_indices = @transform_2, window_bounds = array<i64: 8, 256>}]} {
    %c0 = arith.constant 0 : index
    %c0_0 = arith.constant 0 : index
    %0 = vector.load %arg3[%c0, %c0_0] : memref<8x256xf32, #tpu.memory_space<vmem>>, vector<8x256xf32>
    %c0_1 = arith.constant 0 : index
    %c0_2 = arith.constant 0 : index
    %1 = vector.load %arg2[%c0_1, %c0_2] : memref<8x1xf32, #tpu.memory_space<vmem>>, vector<8x1xf32>
    %2 = vector.broadcast %1 : vector<8x1xf32> to vector<8x256xf32>
    %3 = arith.mulf %0, %2 : vector<8x256xf32>
    %c0_3 = arith.constant 0 : index
    %c0_4 = arith.constant 0 : index
    %4 = vector.load %arg4[%c0_3, %c0_4] : memref<8x256xf32, #tpu.memory_space<vmem>>, vector<8x256xf32>
    tpu.vector_store %arg4[%c0_3, %c0_4], %3 {strides = array<i32>} : memref<8x256xf32, #tpu.memory_space<vmem>>, vector<8x256xf32>,
    return
  }
  func.func @transform_0(%arg0: i32, %arg1: i32) -> (i32, i32) {
    %c0_i32 = arith.constant 0 : i32
    %c0_i32_0 = arith.constant 0 : i32
    return %arg0, %c0_i32 : i32, i32
  }
  func.func @transform_1(%arg0: i32, %arg1: i32) -> (i32, i32) {
    %c0_i32 = arith.constant 0 : i32
    return %arg0, %arg1 : i32, i32
  }
  func.func @transform_2(%arg0: i32, %arg1: i32) -> (i32, i32) {
    %c0_i32 = arith.constant 0 : i32
    return %arg0, %arg1 : i32, i32
  }
}

</mosaic_0001>

<bundles_post_ra>
// kernel: drop_path.1
= control target key start
LH: loop header
LB: loop body
LE: loop exit
PB: predicated region body
PF: predicated region fallthrough
CT: control target
= control target key end

     0   :  { %v29_v0 = vmov 0   ;;  %s60_s0 = inlined_call_operand.vmem [shape: f32[8,1], index: 0, kind: input, shape index: {}]   ;;  %s61_s1 = inlined_call_operand.vmem [shape: f32[8,256], index: 1, kind: input, shape index: {}]   ;;  %s62_s2 = inlined_call_operand.vmem [shape: f32[8,256], index: 2, kind: output, shape index: {}]  }
   0x1   :  { %28 = vset.pattern.permute.xlu0 %v29_v0  ;;  %v13_v1 = vld [vmem:[%s60_s0] sm:$0xff]  ;;  %v12_v3 = vld [vmem:[%s61_s1 + $0x8] sm:$0xff] }
   0x2   :  { %16 = vperm.xlu0 %28, %v13_v1   ;;  %v11_v2 = vld [vmem:[%s61_s1] sm:$0xff] }
  0x81   :  { %v17_v4 = vpop.permute.xlu0 %16 }
  0x82   :  { %v19_v5 = vmul.f32 %v17_v4, %v11_v2  ;;  %v20_v6 = vmul.f32 %v17_v4, %v12_v3 }
  0x84   :  { %21 = vst [vmem:[%s62_s2] sm:$0xff] %v19_v5  ;;  %22 = vst [vmem:[%s62_s2 + $0x8] sm:$0xff] %v20_v6 }

</bundles_post_ra>
